<compile_context>
chip_gen: v6e
topology: v6e:2x2x1
jax: 0.10.0
libtpu: 0.0.40
codegen_flags: <defaults>
</compile_context>

<pallas_src>
import jax
import jax.numpy as jnp
from jax.experimental import pallas as pl
from jax.experimental.pallas import tpu as pltpu


def lstm_fused_kernel(x_ref, wih_ref, whh_ref, bias_ref, wlin_ref, blin_ref,
                      out_ref):
    """Fully fused LSTM forward.

    x_ref   : (T*B, D) f32 — time-major flattened input.
    wih_ref : (D, 4H)  bf16 — input weights, gate columns ordered [i, f, o, g].
    whh_ref : (H, 4H)  bf16 — recurrent weights, same column order.
    bias_ref: (1, 4H)  f32  — b_ih + b_hh, same column order.
    wlin_ref: (1, H)   f32  — linear-head weights.
    blin_ref: (1, 1)   f32  — linear-head bias.
    out_ref : (B, 1)   f32  — linear(h_T) per batch row.
    """
    TB = x_ref.shape[0]
    H4 = whh_ref.shape[1]
    H = H4 // 4
    B = out_ref.shape[0]
    T = TB // B

    whh = whh_ref[...]                       # (H, 4H) — loop-invariant MXU RHS
    bias = bias_ref[...]                     # (1, 4H)

    # Hoisted input projection, fused in-kernel: one (T*B, D)@(D, 4H) MXU pass
    # covering every timestep, result stays resident in vregs/VMEM.
    gx = jnp.dot(x_ref[...].astype(jnp.bfloat16), wih_ref[...],
                 preferred_element_type=jnp.float32) + bias       # (T*B, 4H)

    h = jnp.zeros((B, H), jnp.float32)
    c = jnp.zeros((B, H), jnp.float32)

    # T is small and static: fully unroll so every slice index is static and
    # the scheduler can overlap the off-critical-path work across steps.
    for t in range(T):
        gx_t = gx[t * B:(t + 1) * B, :]                           # (B, 4H)
        if t == 0:
            gates = gx_t                                          # h0 == 0
        else:
            gates = gx_t + jnp.dot(h.astype(jnp.bfloat16), whh,
                                   preferred_element_type=jnp.float32)
        sig = jax.nn.sigmoid(gates[:, :3 * H])   # one EUP pass over i, f, o
        g_g = jnp.tanh(gates[:, 3 * H:])         # cell candidate
        i_g = sig[:, 0 * H:1 * H]
        f_g = sig[:, 1 * H:2 * H]
        o_g = sig[:, 2 * H:3 * H]
        c = f_g * c + i_g * g_g
        h = o_g * jnp.tanh(c)

    # Fused linear head: elementwise multiply + lane reduce (avoids an N=1
    # MXU dot); matches `self.linear(hn[0])`.
    out_ref[...] = (jnp.sum(h * wlin_ref[...], axis=1, keepdims=True)
                    + blin_ref[...])


def _reorder_gates(w):
    # PyTorch packs the 4H axis as [i, f, g, o]; reorder to [i, f, o, g] so one
    # sigmoid covers a contiguous 3H block and one tanh covers the rest.
    i, f, g, o = jnp.split(w, 4, axis=-1)
    return jnp.concatenate([i, f, o, g], axis=-1)


def prepare_params(params):
    """One-time parameter prep: transpose, gate reorder, dtype, 2-D shapes."""
    w_ih, w_hh, b_ih, b_hh, w_lin, b_lin = params
    wih_t = _reorder_gates(
        jnp.transpose(w_ih).astype(jnp.float32)).astype(jnp.bfloat16)  # (D, 4H)
    whh_t = _reorder_gates(
        jnp.transpose(w_hh).astype(jnp.float32)).astype(jnp.bfloat16)  # (H, 4H)
    bias = _reorder_gates((b_ih + b_hh).astype(jnp.float32)).reshape(1, -1)
    wlin = w_lin.astype(jnp.float32).reshape(1, -1)                    # (1, H)
    blin = b_lin.astype(jnp.float32).reshape(1, 1)                     # (1, 1)
    return (wih_t, whh_t, bias, wlin, blin)


@jax.jit
def lstm_forward(x, prepped):
    """x: (B, T, D) float32.  Returns (B,) like `self.linear(hn[0]).flatten()`."""
    wih_t, whh_t, bias, wlin, blin = prepped
    B, T, D = x.shape

    # Time-major flatten so each timestep is a dense contiguous (B, 4H) slab
    # inside the kernel (64 floats; the only op outside the pallas_call).
    x_flat = jnp.transpose(x.astype(jnp.float32), (1, 0, 2)).reshape(T * B, D)

    vmem = pl.BlockSpec(memory_space=pltpu.MemorySpace.VMEM)
    out = pl.pallas_call(
        lstm_fused_kernel,
        out_shape=jax.ShapeDtypeStruct((B, 1), jnp.float32),
        in_specs=[vmem] * 6,
        out_specs=vmem,
    )(x_flat, wih_t, whh_t, bias, wlin, blin)
    return out.reshape(-1)                                             # (B,)


def init_params(key, num_sensors, hidden_units):
    """Deterministic init mimicking PyTorch's uniform(-1/sqrt(H), 1/sqrt(H))."""
    H, D = hidden_units, num_sensors
    k = 1.0 / jnp.sqrt(jnp.float32(H))
    keys = jax.random.split(key, 6)
    w_ih = jax.random.uniform(keys[0], (4 * H, D), jnp.float32, -k, k)
    w_hh = jax.random.uniform(keys[1], (4 * H, H), jnp.float32, -k, k)
    b_ih = jax.random.uniform(keys[2], (4 * H,), jnp.float32, -k, k)
    b_hh = jax.random.uniform(keys[3], (4 * H,), jnp.float32, -k, k)
    w_lin = jax.random.uniform(keys[4], (1, H), jnp.float32, -k, k)
    b_lin = jax.random.uniform(keys[5], (1,), jnp.float32, -k, k)
    return (w_ih, w_hh, b_ih, b_hh, w_lin, b_lin)


if __name__ == "__main__":
    # Small shapes consistent with the module: batch=2, seq=8, num_sensors=4,
    # hidden_units=32.
    B, T, D, H = 2, 8, 4, 32
    key = jax.random.PRNGKey(0)
    kx, kp = jax.random.split(key)
    x = jax.random.normal(kx, (B, T, D), jnp.float32)
    params = init_params(kp, D, H)
    prepped = prepare_params(params)          # one-time parameter prep

    out = lstm_forward(x, prepped)
    jax.block_until_ready(out)
    assert out.shape == (B,)
    assert bool(jnp.all(jnp.isfinite(out)))
    print("KERNEL_OK")
</pallas_src>

<mosaic_0001>
module attributes {stable_mosaic.version = 11 : i64} {
  func.func @lstm_fused_kernel(%arg0: memref<16x4xf32, #tpu.memory_space<vmem>>, %arg1: memref<4x128xbf16, #tpu.memory_space<vmem>>, %arg2: memref<32x128xbf16, #tpu.memory_space<vmem>>, %arg3: memref<1x128xf32, #tpu.memory_space<vmem>>, %arg4: memref<1x32xf32, #tpu.memory_space<vmem>>, %arg5: memref<1x1xf32, #tpu.memory_space<vmem>>, %arg6: memref<2x1xf32, #tpu.memory_space<vmem>>) attributes {dimension_semantics = [], scalar_prefetch = 0 : i64, scratch_operands = 0 : i64, tpu.core_type = #tpu.core_type<tc>} {
    %c0 = arith.constant 0 : index
    %c0_0 = arith.constant 0 : index
    %0 = vector.load %arg2[%c0, %c0_0] : memref<32x128xbf16, #tpu.memory_space<vmem>>, vector<32x128xbf16>
    %c0_1 = arith.constant 0 : index
    %c0_2 = arith.constant 0 : index
    %1 = vector.load %arg3[%c0_1, %c0_2] : memref<1x128xf32, #tpu.memory_space<vmem>>, vector<1x128xf32>
    %c0_3 = arith.constant 0 : index
    %c0_4 = arith.constant 0 : index
    %2 = vector.load %arg0[%c0_3, %c0_4] : memref<16x4xf32, #tpu.memory_space<vmem>>, vector<16x4xf32>
    %3 = arith.truncf %2 : vector<16x4xf32> to vector<16x4xbf16>
    %c0_5 = arith.constant 0 : index
    %c0_6 = arith.constant 0 : index
    %4 = vector.load %arg1[%c0_5, %c0_6] : memref<4x128xbf16, #tpu.memory_space<vmem>>, vector<4x128xbf16>
    %cst = arith.constant dense<0.000000e+00> : vector<16x128xf32>
    %5 = tpu.matmul %3, %4, %cst {dimension_numbers = #tpu.dot_dimension_numbers<[1], [0], [0], [1], [0, 0, 1, 1], [], []>} : vector<16x4xbf16>, vector<4x128xbf16>, vector<16x128xf32> -> vector<16x128xf32>
    %6 = vector.broadcast %1 : vector<1x128xf32> to vector<16x128xf32>
    %7 = arith.addf %5, %6 : vector<16x128xf32>
    %cst_7 = arith.constant 0.000000e+00 : f32
    %8 = vector.broadcast %cst_7 : f32 to vector<2x32xf32>
    %9 = vector.extract_strided_slice %7 {offsets = [0, 0], sizes = [2, 128], strides = [1, 1]} : vector<16x128xf32> to vector<2x128xf32>
    %10 = vector.extract_strided_slice %9 {offsets = [0, 0], sizes = [2, 96], strides = [1, 1]} : vector<2x128xf32> to vector<2x96xf32>
    %11 = arith.negf %10 : vector<2x96xf32>
    %12 = math.exp %11 : vector<2x96xf32>
    %cst_8 = arith.constant 1.000000e+00 : f32
    %13 = vector.broadcast %cst_8 : f32 to vector<2x96xf32>
    %14 = arith.addf %13, %12 : vector<2x96xf32>
    %15 = arith.divf %13, %14 : vector<2x96xf32>
    %16 = vector.extract_strided_slice %9 {offsets = [0, 96], sizes = [2, 32], strides = [1, 1]} : vector<2x128xf32> to vector<2x32xf32>
    %17 = math.tanh %16 : vector<2x32xf32>
    %18 = vector.extract_strided_slice %15 {offsets = [0, 0], sizes = [2, 32], strides = [1, 1]} : vector<2x96xf32> to vector<2x32xf32>
    %19 = vector.extract_strided_slice %15 {offsets = [0, 32], sizes = [2, 32], strides = [1, 1]} : vector<2x96xf32> to vector<2x32xf32>
    %20 = vector.extract_strided_slice %15 {offsets = [0, 64], sizes = [2, 32], strides = [1, 1]} : vector<2x96xf32> to vector<2x32xf32>
    %21 = arith.mulf %19, %8 : vector<2x32xf32>
    %22 = arith.mulf %18, %17 : vector<2x32xf32>
    %23 = arith.addf %21, %22 : vector<2x32xf32>
    %24 = math.tanh %23 : vector<2x32xf32>
    %25 = arith.mulf %20, %24 : vector<2x32xf32>
    %26 = vector.extract_strided_slice %7 {offsets = [2, 0], sizes = [2, 128], strides = [1, 1]} : vector<16x128xf32> to vector<2x128xf32>
    %27 = arith.truncf %25 : vector<2x32xf32> to vector<2x32xbf16>
    %cst_9 = arith.constant dense<0.000000e+00> : vector<2x128xf32>
    %28 = tpu.matmul %27, %0, %cst_9 {dimension_numbers = #tpu.dot_dimension_numbers<[1], [0], [0], [1], [0, 0, 1, 1], [], []>} : vector<2x32xbf16>, vector<32x128xbf16>, vector<2x128xf32> -> vector<2x128xf32>
    %29 = arith.addf %26, %28 : vector<2x128xf32>
    %30 = vector.extract_strided_slice %29 {offsets = [0, 0], sizes = [2, 96], strides = [1, 1]} : vector<2x128xf32> to vector<2x96xf32>
    %31 = arith.negf %30 : vector<2x96xf32>
    %32 = math.exp %31 : vector<2x96xf32>
    %cst_10 = arith.constant 1.000000e+00 : f32
    %33 = vector.broadcast %cst_10 : f32 to vector<2x96xf32>
    %34 = arith.addf %33, %32 : vector<2x96xf32>
    %35 = arith.divf %33, %34 : vector<2x96xf32>
    %36 = vector.extract_strided_slice %29 {offsets = [0, 96], sizes = [2, 32], strides = [1, 1]} : vector<2x128xf32> to vector<2x32xf32>
    %37 = math.tanh %36 : vector<2x32xf32>
    %38 = vector.extract_strided_slice %35 {offsets = [0, 0], sizes = [2, 32], strides = [1, 1]} : vector<2x96xf32> to vector<2x32xf32>
    %39 = vector.extract_strided_slice %35 {offsets = [0, 32], sizes = [2, 32], strides = [1, 1]} : vector<2x96xf32> to vector<2x32xf32>
    %40 = vector.extract_strided_slice %35 {offsets = [0, 64], sizes = [2, 32], strides = [1, 1]} : vector<2x96xf32> to vector<2x32xf32>
    %41 = arith.mulf %39, %23 : vector<2x32xf32>
    %42 = arith.mulf %38, %37 : vector<2x32xf32>
    %43 = arith.addf %41, %42 : vector<2x32xf32>
    %44 = math.tanh %43 : vector<2x32xf32>
    %45 = arith.mulf %40, %44 : vector<2x32xf32>
    %46 = vector.extract_strided_slice %7 {offsets = [4, 0], sizes = [2, 128], strides = [1, 1]} : vector<16x128xf32> to vector<2x128xf32>
    %47 = arith.truncf %45 : vector<2x32xf32> to vector<2x32xbf16>
    %cst_11 = arith.constant dense<0.000000e+00> : vector<2x128xf32>
    %48 = tpu.matmul %47, %0, %cst_11 {dimension_numbers = #tpu.dot_dimension_numbers<[1], [0], [0], [1], [0, 0, 1, 1], [], []>} : vector<2x32xbf16>, vector<32x128xbf16>, vector<2x128xf32> -> vector<2x128xf32>
    %49 = arith.addf %46, %48 : vector<2x128xf32>
    %50 = vector.extract_strided_slice %49 {offsets = [0, 0], sizes = [2, 96], strides = [1, 1]} : vector<2x128xf32> to vector<2x96xf32>
    %51 = arith.negf %50 : vector<2x96xf32>
    %52 = math.exp %51 : vector<2x96xf32>
    %cst_12 = arith.constant 1.000000e+00 : f32
    %53 = vector.broadcast %cst_12 : f32 to vector<2x96xf32>
    %54 = arith.addf %53, %52 : vector<2x96xf32>
    %55 = arith.divf %53, %54 : vector<2x96xf32>
    %56 = vector.extract_strided_slice %49 {offsets = [0, 96], sizes = [2, 32], strides = [1, 1]} : vector<2x128xf32> to vector<2x32xf32>
    %57 = math.tanh %56 : vector<2x32xf32>
    %58 = vector.extract_strided_slice %55 {offsets = [0, 0], sizes = [2, 32], strides = [1, 1]} : vector<2x96xf32> to vector<2x32xf32>
    %59 = vector.extract_strided_slice %55 {offsets = [0, 32], sizes = [2, 32], strides = [1, 1]} : vector<2x96xf32> to vector<2x32xf32>
    %60 = vector.extract_strided_slice %55 {offsets = [0, 64], sizes = [2, 32], strides = [1, 1]} : vector<2x96xf32> to vector<2x32xf32>
    %61 = arith.mulf %59, %43 : vector<2x32xf32>
    %62 = arith.mulf %58, %57 : vector<2x32xf32>
    %63 = arith.addf %61, %62 : vector<2x32xf32>
    %64 = math.tanh %63 : vector<2x32xf32>
    %65 = arith.mulf %60, %64 : vector<2x32xf32>
    %66 = vector.extract_strided_slice %7 {offsets = [6, 0], sizes = [2, 128], strides = [1, 1]} : vector<16x128xf32> to vector<2x128xf32>
    %67 = arith.truncf %65 : vector<2x32xf32> to vector<2x32xbf16>
    %cst_13 = arith.constant dense<0.000000e+00> : vector<2x128xf32>
    %68 = tpu.matmul %67, %0, %cst_13 {dimension_numbers = #tpu.dot_dimension_numbers<[1], [0], [0], [1], [0, 0, 1, 1], [], []>} : vector<2x32xbf16>, vector<32x128xbf16>, vector<2x128xf32> -> vector<2x128xf32>
    %69 = arith.addf %66, %68 : vector<2x128xf32>
    %70 = vector.extract_strided_slice %69 {offsets = [0, 0], sizes = [2, 96], strides = [1, 1]} : vector<2x128xf32> to vector<2x96xf32>
    %71 = arith.negf %70 : vector<2x96xf32>
    %72 = math.exp %71 : vector<2x96xf32>
    %cst_14 = arith.constant 1.000000e+00 : f32
    %73 = vector.broadcast %cst_14 : f32 to vector<2x96xf32>
    %74 = arith.addf %73, %72 : vector<2x96xf32>
    %75 = arith.divf %73, %74 : vector<2x96xf32>
    %76 = vector.extract_strided_slice %69 {offsets = [0, 96], sizes = [2, 32], strides = [1, 1]} : vector<2x128xf32> to vector<2x32xf32>
    %77 = math.tanh %76 : vector<2x32xf32>
    %78 = vector.extract_strided_slice %75 {offsets = [0, 0], sizes = [2, 32], strides = [1, 1]} : vector<2x96xf32> to vector<2x32xf32>
    %79 = vector.extract_strided_slice %75 {offsets = [0, 32], sizes = [2, 32], strides = [1, 1]} : vector<2x96xf32> to vector<2x32xf32>
    %80 = vector.extract_strided_slice %75 {offsets = [0, 64], sizes = [2, 32], strides = [1, 1]} : vector<2x96xf32> to vector<2x32xf32>
    %81 = arith.mulf %79, %63 : vector<2x32xf32>
    %82 = arith.mulf %78, %77 : vector<2x32xf32>
    %83 = arith.addf %81, %82 : vector<2x32xf32>
    %84 = math.tanh %83 : vector<2x32xf32>
    %85 = arith.mulf %80, %84 : vector<2x32xf32>
    %86 = vector.extract_strided_slice %7 {offsets = [8, 0], sizes = [2, 128], strides = [1, 1]} : vector<16x128xf32> to vector<2x128xf32>
    %87 = arith.truncf %85 : vector<2x32xf32> to vector<2x32xbf16>
    %cst_15 = arith.constant dense<0.000000e+00> : vector<2x128xf32>
    %88 = tpu.matmul %87, %0, %cst_15 {dimension_numbers = #tpu.dot_dimension_numbers<[1], [0], [0], [1], [0, 0, 1, 1], [], []>} : vector<2x32xbf16>, vector<32x128xbf16>, vector<2x128xf32> -> vector<2x128xf32>
    %89 = arith.addf %86, %88 : vector<2x128xf32>
    %90 = vector.extract_strided_slice %89 {offsets = [0, 0], sizes = [2, 96], strides = [1, 1]} : vector<2x128xf32> to vector<2x96xf32>
    %91 = arith.negf %90 : vector<2x96xf32>
    %92 = math.exp %91 : vector<2x96xf32>
    %cst_16 = arith.constant 1.000000e+00 : f32
    %93 = vector.broadcast %cst_16 : f32 to vector<2x96xf32>
    %94 = arith.addf %93, %92 : vector<2x96xf32>
    %95 = arith.divf %93, %94 : vector<2x96xf32>
    %96 = vector.extract_strided_slice %89 {offsets = [0, 96], sizes = [2, 32], strides = [1, 1]} : vector<2x128xf32> to vector<2x32xf32>
    %97 = math.tanh %96 : vector<2x32xf32>
    %98 = vector.extract_strided_slice %95 {offsets = [0, 0], sizes = [2, 32], strides = [1, 1]} : vector<2x96xf32> to vector<2x32xf32>
    %99 = vector.extract_strided_slice %95 {offsets = [0, 32], sizes = [2, 32], strides = [1, 1]} : vector<2x96xf32> to vector<2x32xf32>
    %100 = vector.extract_strided_slice %95 {offsets = [0, 64], sizes = [2, 32], strides = [1, 1]} : vector<2x96xf32> to vector<2x32xf32>
    %101 = arith.mulf %99, %83 : vector<2x32xf32>
    %102 = arith.mulf %98, %97 : vector<2x32xf32>
    %103 = arith.addf %101, %102 : vector<2x32xf32>
    %104 = math.tanh %103 : vector<2x32xf32>
    %105 = arith.mulf %100, %104 : vector<2x32xf32>
    %106 = vector.extract_strided_slice %7 {offsets = [10, 0], sizes = [2, 128], strides = [1, 1]} : vector<16x128xf32> to vector<2x128xf32>
    %107 = arith.truncf %105 : vector<2x32xf32> to vector<2x32xbf16>
    %cst_17 = arith.constant dense<0.000000e+00> : vector<2x128xf32>
    %108 = tpu.matmul %107, %0, %cst_17 {dimension_numbers = #tpu.dot_dimension_numbers<[1], [0], [0], [1], [0, 0, 1, 1], [], []>} : vector<2x32xbf16>, vector<32x128xbf16>, vector<2x128xf32> -> vector<2x128xf32>
    %109 = arith.addf %106, %108 : vector<2x128xf32>
    %110 = vector.extract_strided_slice %109 {offsets = [0, 0], sizes = [2, 96], strides = [1, 1]} : vector<2x128xf32> to vector<2x96xf32>
    %111 = arith.negf %110 : vector<2x96xf32>
    %112 = math.exp %111 : vector<2x96xf32>
    %cst_18 = arith.constant 1.000000e+00 : f32
    %113 = vector.broadcast %cst_18 : f32 to vector<2x96xf32>
    %114 = arith.addf %113, %112 : vector<2x96xf32>
    %115 = arith.divf %113, %114 : vector<2x96xf32>
    %116 = vector.extract_strided_slice %109 {offsets = [0, 96], sizes = [2, 32], strides = [1, 1]} : vector<2x128xf32> to vector<2x32xf32>
    %117 = math.tanh %116 : vector<2x32xf32>
    %118 = vector.extract_strided_slice %115 {offsets = [0, 0], sizes = [2, 32], strides = [1, 1]} : vector<2x96xf32> to vector<2x32xf32>
    %119 = vector.extract_strided_slice %115 {offsets = [0, 32], sizes = [2, 32], strides = [1, 1]} : vector<2x96xf32> to vector<2x32xf32>
    %120 = vector.extract_strided_slice %115 {offsets = [0, 64], sizes = [2, 32], strides = [1, 1]} : vector<2x96xf32> to vector<2x32xf32>
    %121 = arith.mulf %119, %103 : vector<2x32xf32>
    %122 = arith.mulf %118, %117 : vector<2x32xf32>
    %123 = arith.addf %121, %122 : vector<2x32xf32>
    %124 = math.tanh %123 : vector<2x32xf32>
    %125 = arith.mulf %120, %124 : vector<2x32xf32>
    %126 = vector.extract_strided_slice %7 {offsets = [12, 0], sizes = [2, 128], strides = [1, 1]} : vector<16x128xf32> to vector<2x128xf32>
    %127 = arith.truncf %125 : vector<2x32xf32> to vector<2x32xbf16>
    %cst_19 = arith.constant dense<0.000000e+00> : vector<2x128xf32>
    %128 = tpu.matmul %127, %0, %cst_19 {dimension_numbers = #tpu.dot_dimension_numbers<[1], [0], [0], [1], [0, 0, 1, 1], [], []>} : vector<2x32xbf16>, vector<32x128xbf16>, vector<2x128xf32> -> vector<2x128xf32>
    %129 = arith.addf %126, %128 : vector<2x128xf32>
    %130 = vector.extract_strided_slice %129 {offsets = [0, 0], sizes = [2, 96], strides = [1, 1]} : vector<2x128xf32> to vector<2x96xf32>
    %131 = arith.negf %130 : vector<2x96xf32>
    %132 = math.exp %131 : vector<2x96xf32>
    %cst_20 = arith.constant 1.000000e+00 : f32
    %133 = vector.broadcast %cst_20 : f32 to vector<2x96xf32>
    %134 = arith.addf %133, %132 : vector<2x96xf32>
    %135 = arith.divf %133, %134 : vector<2x96xf32>
    %136 = vector.extract_strided_slice %129 {offsets = [0, 96], sizes = [2, 32], strides = [1, 1]} : vector<2x128xf32> to vector<2x32xf32>
    %137 = math.tanh %136 : vector<2x32xf32>
    %138 = vector.extract_strided_slice %135 {offsets = [0, 0], sizes = [2, 32], strides = [1, 1]} : vector<2x96xf32> to vector<2x32xf32>
    %139 = vector.extract_strided_slice %135 {offsets = [0, 32], sizes = [2, 32], strides = [1, 1]} : vector<2x96xf32> to vector<2x32xf32>
    %140 = vector.extract_strided_slice %135 {offsets = [0, 64], sizes = [2, 32], strides = [1, 1]} : vector<2x96xf32> to vector<2x32xf32>
    %141 = arith.mulf %139, %123 : vector<2x32xf32>
    %142 = arith.mulf %138, %137 : vector<2x32xf32>
    %143 = arith.addf %141, %142 : vector<2x32xf32>
    %144 = math.tanh %143 : vector<2x32xf32>
    %145 = arith.mulf %140, %144 : vector<2x32xf32>
    %146 = vector.extract_strided_slice %7 {offsets = [14, 0], sizes = [2, 128], strides = [1, 1]} : vector<16x128xf32> to vector<2x128xf32>
    %147 = arith.truncf %145 : vector<2x32xf32> to vector<2x32xbf16>
    %cst_21 = arith.constant dense<0.000000e+00> : vector<2x128xf32>
    %148 = tpu.matmul %147, %0, %cst_21 {dimension_numbers = #tpu.dot_dimension_numbers<[1], [0], [0], [1], [0, 0, 1, 1], [], []>} : vector<2x32xbf16>, vector<32x128xbf16>, vector<2x128xf32> -> vector<2x128xf32>
    %149 = arith.addf %146, %148 : vector<2x128xf32>
    %150 = vector.extract_strided_slice %149 {offsets = [0, 0], sizes = [2, 96], strides = [1, 1]} : vector<2x128xf32> to vector<2x96xf32>
    %151 = arith.negf %150 : vector<2x96xf32>
    %152 = math.exp %151 : vector<2x96xf32>
    %cst_22 = arith.constant 1.000000e+00 : f32
    %153 = vector.broadcast %cst_22 : f32 to vector<2x96xf32>
    %154 = arith.addf %153, %152 : vector<2x96xf32>
    %155 = arith.divf %153, %154 : vector<2x96xf32>
    %156 = vector.extract_strided_slice %149 {offsets = [0, 96], sizes = [2, 32], strides = [1, 1]} : vector<2x128xf32> to vector<2x32xf32>
    %157 = math.tanh %156 : vector<2x32xf32>
    %158 = vector.extract_strided_slice %155 {offsets = [0, 0], sizes = [2, 32], strides = [1, 1]} : vector<2x96xf32> to vector<2x32xf32>
    %159 = vector.extract_strided_slice %155 {offsets = [0, 32], sizes = [2, 32], strides = [1, 1]} : vector<2x96xf32> to vector<2x32xf32>
    %160 = vector.extract_strided_slice %155 {offsets = [0, 64], sizes = [2, 32], strides = [1, 1]} : vector<2x96xf32> to vector<2x32xf32>
    %161 = arith.mulf %159, %143 : vector<2x32xf32>
    %162 = arith.mulf %158, %157 : vector<2x32xf32>
    %163 = arith.addf %161, %162 : vector<2x32xf32>
    %164 = math.tanh %163 : vector<2x32xf32>
    %165 = arith.mulf %160, %164 : vector<2x32xf32>
    %c0_23 = arith.constant 0 : index
    %c0_24 = arith.constant 0 : index
    %166 = vector.load %arg4[%c0_23, %c0_24] : memref<1x32xf32, #tpu.memory_space<vmem>>, vector<1x32xf32>
    %167 = vector.broadcast %166 : vector<1x32xf32> to vector<2x32xf32>
    %168 = arith.mulf %165, %167 : vector<2x32xf32>
    %cst_25 = arith.constant dense<0.000000e+00> : vector<2xf32>
    %169 = vector.multi_reduction <add>, %168, %cst_25 [1] : vector<2x32xf32> to vector<2xf32>
    %170 = vector.shape_cast %169 : vector<2xf32> to vector<2x1xf32>
    %c0_26 = arith.constant 0 : index
    %c0_27 = arith.constant 0 : index
    %171 = vector.load %arg5[%c0_26, %c0_27] : memref<1x1xf32, #tpu.memory_space<vmem>>, vector<1x1xf32>
    %172 = vector.broadcast %171 : vector<1x1xf32> to vector<2x1xf32>
    %173 = arith.addf %170, %172 : vector<2x1xf32>
    %c0_28 = arith.constant 0 : index
    %c0_29 = arith.constant 0 : index
    %174 = vector.load %arg6[%c0_28, %c0_29] : memref<2x1xf32, #tpu.memory_space<vmem>>, vector<2x1xf32>
    tpu.vector_store %arg6[%c0_28, %c0_29], %173 {strides = array<i32>} : memref<2x1xf32, #tpu.memory_space<vmem>>, vector<2x1xf32>,
    return
  }
}

</mosaic_0001>

<bundles_post_ra>
// kernel: lstm_forward.1
= control target key start
LH: loop header
LB: loop body
LE: loop exit
PB: predicated region body
PF: predicated region fallthrough
CT: control target
= control target key end

     0   :  { %vm45_vm0 = vcmask 1041408   ;;  %v883_v0 = vmov 0.0   ;;  %vm884_vm1 = vmmov 0   ;;  %vm41_vm2 = vcmask 31744   ;;  %s1051_s1 = inlined_call_operand.vmem [shape: bf16[4,128], index: 1, kind: input, shape index: {}]   ;;  %s1052_s0 = inlined_call_operand.vmem [shape: f32[16,4], index: 0, kind: input, shape index: {}]   ;;  %s1053_s3 = inlined_call_operand.vmem [shape: f32[1,128], index: 3, kind: input, shape index: {}]   ;;  %s1054_s2 = inlined_call_operand.vmem [shape: bf16[32,128], index: 2, kind: input, shape index: {}]   ;;  %s1055_s4 = inlined_call_operand.vmem [shape: f32[1,32], index: 4, kind: input, shape index: {}]   ;;  %s1056_s5 = inlined_call_operand.<no memory space> [shape: f32[1,1], index: 5, kind: input, shape index: {}]   ;;  %s1057_s6 = inlined_call_operand.vmem [shape: f32[2,1], index: 6, kind: output, shape index: {}]  }
   0x1   :  { %751 = vmatprep.subr.bf16.mxu0 %v883_v0  ;;  %v34_v1 = vld [vmem:[%s1051_s1] sm:$0x3]  ;;  %753 = vmatprep.mubr.msk.bf16.mxu0 %vm884_vm1, %v883_v0  ;;  %v32_v3 = vld [vmem:[%s1052_s0 + $0x8] sm:$0xff]  ;;  %vm130_vm3 = vcmask 261120   ;;  %vm689_vm4 = vcmask 261126   ;;  %vm701_vm5 = vcmask 7174  }
   0x2   :  { %v31_v2 = vld [vmem:[%s1052_s0] sm:$0xff]  ;;  %v47_v4 = vsel %vm45_vm0, %v34_v1, 0  ;;  %757 = vmatprep.subr.bf16.mxu1 %v883_v0  ;;  %761 = vmatprep.mubr.msk.bf16.mxu1 %vm884_vm1, %v883_v0  ;;  %s885_s0 = smov 32   ;;  %v954_v23 = vld [vmem:[%s1054_s2 + $0x8] sm:$0xff]  }
   0x3   :  { %v33_v5 = vpack.c.bf16 %v32_v3, %v31_v2  ;;  %752 = vmatpush3.bf16.msra.mxu0 %v47_v4  ;;  %v707_v6 = vld [vmem:[%s1053_s3] ss:$0 sm:$0xff]  ;;  %758 = vmatpush3.bf16.msra.mxu1 %v954_v23 }
   0x4   :  { %765 = vmatprep.subr.bf16.mxu0 %v883_v0  ;;  %v960_v24 = vld [vmem:[%s1054_s2] sm:$0xff]   ;;  %759 = vmatprep.subr.bf16.mxu1 %v883_v0  ;;  %s886_s2 = smov 64  }
   0x6   :  { %754 = vmatmul.mubr.msk.bf16.vlgmr.msra.gmra.mxu0 %vm41_vm2, %v33_v5 }
   0x7   :  { %769 = vmatprep.mubr.msk.bf16.mxu0 %vm884_vm1, %v883_v0  ;;  %766 = vmatpush3.bf16.msra.mxu0 %v954_v23 }
   0x8   :  { %767 = vmatprep.subr.bf16.mxu0 %v883_v0  ;;  %760 = vmatpush3.bf16.msra.mxu1 %v960_v24 }
   0x9   :  { %773 = vmatprep.subr.bf16.mxu1 %v883_v0 }
   0xb   :  { %768 = vmatpush3.bf16.msra.mxu0 %v960_v24 }
   0xc   :  { %781 = vmatprep.subr.bf16.mxu0 %v883_v0 }
  0xc6   :  { %v83_v7 = vpop.f32.mrf.mxu0 }
  0xc7   :  { %v943_v8 = vadd.f32 %v707_v6, %v83_v7 }
  0xc8   :  { %v755_v9 = vpop.f32.mrf.mxu0 }
  0xc9   :  { %819 = vtanh.f32 %v943_v8  ;;  %v709_v14 = vmul.f32 -1.442695, %v943_v8 }
  0xca   :  { %v86_v10 = vpop.f32.mrf.mxu0 }
  0xcb   :  { %v946_v11 = vadd.f32 %v707_v6, %v86_v10  ;;  %821 = vpow2.f32 %v709_v14 }
  0xcc   :  { %v756_v12 = vpop.f32.mrf.mxu0 }
  0xd6   :  { %v820_v13 = vpop.eup %819 }
  0xd7   :  { %99 = vrot.lane.b32.xlu0 %v820_v13, %s885_s0 }
  0xd8   :  { %v822_v15 = vpop.eup %821 }
  0xd9   :  { %v93_v16 = vadd.f32 1.0, %v822_v15 }
  0xdb   :  { %823 = vrcp.f32 %v93_v16 }
  0xe8   :  { %v824_v17 = vpop.eup %823 }
  0xe9   :  { %v97_v20 = vmul.f32 0.0, %v824_v17 }
 0x149   :  { %v100_v18 = vpop.permute.xlu0 %99 }
 0x14a   :  { %v102_v19 = vmul.f32 %v824_v17, %v100_v18 }
 0x14c   :  { %104 = vrot.lane.b32.xlu0 %v102_v19, %s885_s0 }
 0x1be   :  { %v105_v21 = vpop.permute.xlu0 %104 }
 0x1bf   :  { %v107_v22 = vadd.f32 %v105_v21, %v97_v20 }
 0x1c1   :  { %825 = vtanh.f32 %v107_v22  ;;  %v186_v43 = vrot.slane %v107_v22, 6 }
 0x1ce   :  { %v826_v25 = vpop.eup %825 }
 0x1cf   :  { %110 = vrot.lane.b32.xlu1 %v826_v25, %s885_s0 }
 0x241   :  { %v111_v26 = vpop.permute.xlu1 %110 }
 0x242   :  { %v113_v27 = vmul.f32 %v824_v17, %v111_v26 }
 0x244   :  { %v114_v28 = vpack.c.bf16 %v113_v27, %v113_v27 }
 0x246   :  { %116 = vrot.lane.b32.xlu1 %v114_v28, %s886_s2 }
 0x2b8   :  { %v117_v29 = vpop.permute.xlu1 %116 }
 0x2b9   :  { %762 = vmatmul.mubr.msk.bf16.vlgmr.msra.gmra.mxu1 %vm130_vm3, %v117_v29 }
 0x2ba   :  { %774 = vmatpush3.bf16.msra.mxu1 %v954_v23  ;;  %777 = vmatprep.mubr.msk.bf16.mxu1 %vm884_vm1, %v883_v0 }
 0x2bb   :  { %775 = vmatprep.subr.bf16.mxu1 %v883_v0 }
 0x2be   :  { %776 = vmatpush3.bf16.msra.mxu1 %v960_v24 }
 0x2bf   :  { %789 = vmatprep.subr.bf16.mxu1 %v883_v0 }
 0x379   :  { %v168_v30 = vpop.f32.mrf.mxu1 }
 0x37a   :  { %v175_v31 = vrot.slane %v168_v30, 6 }
 0x37b   :  { %v763_v32 = vpop.f32.mrf.mxu1 }
 0x37c   :  { %v177_v33 = vadd.f32 %v175_v31, %v943_v8 }
 0x37d   :  { %v171_v34 = vpop.f32.mrf.mxu1 }
 0x37e   :  { %827 = vtanh.f32 %v177_v33  ;;  %v713_v37 = vmul.f32 -1.442695, %v177_v33 }
 0x37f   :  { %v764_v35 = vpop.f32.mrf.mxu1 }
 0x380   :  { %829 = vpow2.f32 %v713_v37 }
 0x38b   :  { %v828_v36 = vpop.eup %827 }
 0x38c   :  { %190 = vrot.lane.b32.xlu0 %v828_v36, %s885_s0 }
 0x38d   :  { %v830_v38 = vpop.eup %829 }
 0x38e   :  { %v181_v39 = vadd.f32 1.0, %v830_v38 }
 0x390   :  { %831 = vrcp.f32 %v181_v39 }
 0x39d   :  { %v832_v40 = vpop.eup %831 }
 0x39e   :  { %v188_v44 = vmul.f32 %v832_v40, %v186_v43 }
 0x3fe   :  { %v191_v41 = vpop.permute.xlu0 %190 }
 0x3ff   :  { %v193_v42 = vmul.f32 %v832_v40, %v191_v41 }
 0x401   :  { %195 = vrot.lane.b32.xlu1 %v193_v42, %s885_s0 }
 0x473   :  { %v196_v45 = vpop.permute.xlu1 %195 }
 0x474   :  { %v198_v46 = vadd.f32 %v196_v45, %v188_v44 }
 0x476   :  { %833 = vtanh.f32 %v198_v46  ;;  %v265_v3 = vrot.slane %v198_v46, 6 }
 0x483   :  { %v834_v47 = vpop.eup %833 }
 0x484   :  { %201 = vrot.lane.b32.xlu0 %v834_v47, %s885_s0 }
 0x4f6   :  { %v202_v48 = vpop.permute.xlu0 %201 }
 0x4f7   :  { %v204_v49 = vmul.f32 %v832_v40, %v202_v48 }
 0x4f9   :  { %v205_v50 = vpack.c.bf16 %v204_v49, %v204_v49 }
 0x4fb   :  { %v207_v51 = vrot.slane %v205_v50, 1 }
 0x4fd   :  { %208 = vrot.lane.b32.xlu1 %v207_v51, %s886_s2 }
 0x56f   :  { %v209_v52 = vpop.permute.xlu1 %208 }
 0x570   :  { %770 = vmatmul.mubr.msk.bf16.vlgmr.msra.gmra.mxu0 %vm130_vm3, %v209_v52 }
 0x571   :  { %782 = vmatpush3.bf16.msra.mxu0 %v954_v23  ;;  %785 = vmatprep.mubr.msk.bf16.mxu0 %vm884_vm1, %v883_v0 }
 0x572   :  { %783 = vmatprep.subr.bf16.mxu0 %v883_v0 }
 0x575   :  { %784 = vmatpush3.bf16.msra.mxu0 %v960_v24 }
 0x576   :  { %797 = vmatprep.subr.bf16.mxu0 %v883_v0 }
 0x630   :  { %v247_v53 = vpop.f32.mrf.mxu0 }
 0x631   :  { %v254_v54 = vrot.slane %v247_v53, 4 }
 0x632   :  { %v771_v55 = vpop.f32.mrf.mxu0 }
 0x633   :  { %v256_v56 = vadd.f32 %v254_v54, %v943_v8 }
 0x634   :  { %v250_v57 = vpop.f32.mrf.mxu0 }
 0x635   :  { %835 = vtanh.f32 %v256_v56  ;;  %v715_v60 = vmul.f32 -1.442695, %v256_v56 }
 0x636   :  { %v772_v58 = vpop.f32.mrf.mxu0 }
 0x637   :  { %837 = vpow2.f32 %v715_v60 }
 0x642   :  { %v836_v59 = vpop.eup %835 }
 0x643   :  { %269 = vrot.lane.b32.xlu0 %v836_v59, %s885_s0 }
 0x644   :  { %v838_v61 = vpop.eup %837 }
 0x645   :  { %v260_v62 = vadd.f32 1.0, %v838_v61 }
 0x647   :  { %839 = vrcp.f32 %v260_v62 }
 0x654   :  { %v840_v63 = vpop.eup %839 }
 0x655   :  { %v267_v4 = vmul.f32 %v840_v63, %v265_v3 }
 0x6b5   :  { %v270_v1 = vpop.permute.xlu0 %269 }
 0x6b6   :  { %v272_v2 = vmul.f32 %v840_v63, %v270_v1 }
 0x6b8   :  { %274 = vrot.lane.b32.xlu1 %v272_v2, %s885_s0 }
 0x72a   :  { %v275_v5 = vpop.permute.xlu1 %274 }
 0x72b   :  { %v277_v6 = vadd.f32 %v275_v5, %v267_v4 }
 0x72d   :  { %841 = vtanh.f32 %v277_v6  ;;  %v344_v30 = vrot.slane %v277_v6, 6 }
 0x73a   :  { %v842_v7 = vpop.eup %841 }
 0x73b   :  { %280 = vrot.lane.b32.xlu0 %v842_v7, %s885_s0 }
 0x7ad   :  { %v281_v9 = vpop.permute.xlu0 %280 }
 0x7ae   :  { %v283_v10 = vmul.f32 %v840_v63, %v281_v9 }
 0x7b0   :  { %v284_v12 = vpack.c.bf16 %v283_v10, %v283_v10 }
 0x7b2   :  { %v286_v13 = vrot.slane %v284_v12, 2 }
 0x7b4   :  { %287 = vrot.lane.b32.xlu1 %v286_v13, %s886_s2 }
 0x826   :  { %v288_v14 = vpop.permute.xlu1 %287 }
 0x827   :  { %778 = vmatmul.mubr.msk.bf16.vlgmr.msra.gmra.mxu1 %vm130_vm3, %v288_v14 }
 0x828   :  { %790 = vmatpush3.bf16.msra.mxu1 %v954_v23  ;;  %793 = vmatprep.mubr.msk.bf16.mxu1 %vm884_vm1, %v883_v0 }
 0x829   :  { %791 = vmatprep.subr.bf16.mxu1 %v883_v0 }
 0x82c   :  { %792 = vmatpush3.bf16.msra.mxu1 %v960_v24 }
 0x82d   :  { %805 = vmatprep.subr.bf16.mxu1 %v883_v0 }
 0x8e7   :  { %v326_v15 = vpop.f32.mrf.mxu1 }
 0x8e8   :  { %v333_v16 = vrot.slane %v326_v15, 2 }
 0x8e9   :  { %v779_v17 = vpop.f32.mrf.mxu1 }
 0x8ea   :  { %v335_v18 = vadd.f32 %v333_v16, %v943_v8 }
 0x8eb   :  { %v329_v19 = vpop.f32.mrf.mxu1 }
 0x8ec   :  { %843 = vtanh.f32 %v335_v18  ;;  %v717_v22 = vmul.f32 -1.442695, %v335_v18 }
 0x8ed   :  { %v780_v20 = vpop.f32.mrf.mxu1 }
 0x8ee   :  { %845 = vpow2.f32 %v717_v22 }
 0x8f9   :  { %v844_v21 = vpop.eup %843 }
 0x8fa   :  { %348 = vrot.lane.b32.xlu0 %v844_v21, %s885_s0 }
 0x8fb   :  { %v846_v25 = vpop.eup %845 }
 0x8fc   :  { %v339_v26 = vadd.f32 1.0, %v846_v25 }
 0x8fe   :  { %847 = vrcp.f32 %v339_v26 }
 0x90b   :  { %v848_v27 = vpop.eup %847 }
 0x90c   :  { %v346_v31 = vmul.f32 %v848_v27, %v344_v30 }
 0x96c   :  { %v349_v28 = vpop.permute.xlu0 %348 }
 0x96d   :  { %v351_v29 = vmul.f32 %v848_v27, %v349_v28 }
 0x96f   :  { %353 = vrot.lane.b32.xlu1 %v351_v29, %s885_s0 }
 0x9e1   :  { %v354_v32 = vpop.permute.xlu1 %353 }
 0x9e2   :  { %v356_v8 = vadd.f32 %v354_v32, %v346_v31 }
 0x9e4   :  { %849 = vtanh.f32 %v356_v8  ;;  %v420_v51 = vrot.slane %v356_v8, 6 }
 0x9f1   :  { %v850_v33 = vpop.eup %849 }
 0x9f2   :  { %359 = vrot.lane.b32.xlu0 %v850_v33, %s885_s0 }
 0xa64   :  { %v360_v34 = vpop.permute.xlu0 %359 }
 0xa65   :  { %v362_v35 = vmul.f32 %v848_v27, %v360_v34 }
 0xa67   :  { %v363_v36 = vpack.c.bf16 %v362_v35, %v362_v35 }
 0xa69   :  { %v365_v37 = vrot.slane %v363_v36, 3 }
 0xa6b   :  { %366 = vrot.lane.b32.xlu1 %v365_v37, %s886_s2 }
 0xadd   :  { %v367_v38 = vpop.permute.xlu1 %366 }
 0xade   :  { %786 = vmatmul.mubr.msk.bf16.vlgmr.msra.gmra.mxu0 %vm130_vm3, %v367_v38 }
 0xadf   :  { %798 = vmatpush3.bf16.msra.mxu0 %v954_v23  ;;  %801 = vmatprep.mubr.msk.bf16.mxu0 %vm884_vm1, %v883_v0 }
 0xae0   :  { %799 = vmatprep.subr.bf16.mxu0 %v883_v0 }
 0xae3   :  { %800 = vmatpush3.bf16.msra.mxu0 %v960_v24 }
 0xb9e   :  { %v405_v39 = vpop.f32.mrf.mxu0 }
 0xb9f   :  { %v411_v40 = vadd.f32 %v405_v39, %v946_v11 }
 0xba0   :  { %v787_v41 = vpop.f32.mrf.mxu0 }
 0xba1   :  { %851 = vtanh.f32 %v411_v40  ;;  %v719_v45 = vmul.f32 -1.442695, %v411_v40 }
 0xba2   :  { %v408_v42 = vpop.f32.mrf.mxu0 }
 0xba3   :  { %853 = vpow2.f32 %v719_v45 }
 0xba4   :  { %v788_v43 = vpop.f32.mrf.mxu0 }
 0xbae   :  { %v852_v44 = vpop.eup %851 }
 0xbaf   :  { %424 = vrot.lane.b32.xlu0 %v852_v44, %s885_s0 }
 0xbb0   :  { %v854_v46 = vpop.eup %853 }
 0xbb1   :  { %v415_v47 = vadd.f32 1.0, %v854_v46 }
 0xbb3   :  { %855 = vrcp.f32 %v415_v47 }
 0xbc0   :  { %v856_v48 = vpop.eup %855 }
 0xbc1   :  { %v422_v52 = vmul.f32 %v856_v48, %v420_v51 }
 0xc21   :  { %v425_v49 = vpop.permute.xlu0 %424 }
 0xc22   :  { %v427_v50 = vmul.f32 %v856_v48, %v425_v49 }
 0xc24   :  { %429 = vrot.lane.b32.xlu1 %v427_v50, %s885_s0 }
 0xc96   :  { %v430_v53 = vpop.permute.xlu1 %429 }
 0xc97   :  { %v432_v54 = vadd.f32 %v430_v53, %v422_v52 }
 0xc99   :  { %857 = vtanh.f32 %v432_v54 }
 0xca6   :  { %v858_v55 = vpop.eup %857 }
 0xca7   :  { %435 = vrot.lane.b32.xlu0 %v858_v55, %s885_s0 }
 0xd19   :  { %v436_v56 = vpop.permute.xlu0 %435 }
 0xd1a   :  { %v438_v57 = vmul.f32 %v856_v48, %v436_v56 }
 0xd1c   :  { %v439_v58 = vpack.c.bf16 %v438_v57, %v438_v57 }
 0xd1e   :  { %441 = vrot.lane.b32.xlu1 %v439_v58, %s886_s2 }
 0xd90   :  { %v442_v59 = vpop.permute.xlu1 %441 }
 0xd91   :  { %794 = vmatmul.mubr.msk.bf16.vlgmr.msra.gmra.mxu1 %vm130_vm3, %v442_v59 }
 0xd92   :  { %806 = vmatpush3.bf16.msra.mxu1 %v954_v23  ;;  %809 = vmatprep.mubr.msk.bf16.mxu1 %vm884_vm1, %v883_v0 }
 0xd93   :  { %807 = vmatprep.subr.bf16.mxu1 %v883_v0 }
 0xd96   :  { %808 = vmatpush3.bf16.msra.mxu1 %v960_v24  ;;  %v498_v24 = vrot.slane %v432_v54, 6 }
 0xe51   :  { %v480_v60 = vpop.f32.mrf.mxu1 }
 0xe52   :  { %v487_v61 = vrot.slane %v480_v60, 6 }
 0xe53   :  { %v795_v62 = vpop.f32.mrf.mxu1 }
 0xe54   :  { %v489_v63 = vadd.f32 %v487_v61, %v946_v11  ;;  %v11_v61 = vstv %s1056_s5 }
 0xe55   :  { %v483_v1 = vpop.f32.mrf.mxu1  ;;  %12 = vst [vmem:[#allocation2] sm:$0x1] %v11_v61 }
 0xe56   :  { %859 = vtanh.f32 %v489_v63  ;;  %v721_v4 = vmul.f32 -1.442695, %v489_v63 }
 0xe57   :  { %v796_v2 = vpop.f32.mrf.mxu1 }
 0xe58   :  { %861 = vpow2.f32 %v721_v4 }
 0xe63   :  { %v860_v3 = vpop.eup %859 }
 0xe64   :  { %502 = vrot.lane.b32.xlu0 %v860_v3, %s885_s0 }
 0xe65   :  { %v862_v23 = vpop.eup %861 }
 0xe66   :  { %v493_v5 = vadd.f32 1.0, %v862_v23  ;;  %v727_v23 = vld [vmem:[#allocation2] ss:$0 sm:$0xff] }
 0xe68   :  { %863 = vrcp.f32 %v493_v5 }
 0xe75   :  { %v864_v6 = vpop.eup %863 }
 0xe76   :  { %v500_v9 = vmul.f32 %v864_v6, %v498_v24 }
 0xed6   :  { %v503_v0 = vpop.permute.xlu0 %502 }
 0xed7   :  { %v505_v7 = vmul.f32 %v864_v6, %v503_v0 }
 0xed9   :  { %507 = vrot.lane.b32.xlu1 %v505_v7, %s885_s0 }
 0xf4b   :  { %v508_v10 = vpop.permute.xlu1 %507 }
 0xf4c   :  { %v510_v12 = vadd.f32 %v508_v10, %v500_v9 }
 0xf4e   :  { %865 = vtanh.f32 %v510_v12  ;;  %v577_v33 = vrot.slane %v510_v12, 6 }
 0xf5b   :  { %v866_v13 = vpop.eup %865 }
 0xf5c   :  { %513 = vrot.lane.b32.xlu0 %v866_v13, %s885_s0 }
 0xfce   :  { %v514_v14 = vpop.permute.xlu0 %513 }
 0xfcf   :  { %v516_v15 = vmul.f32 %v864_v6, %v514_v14 }
 0xfd1   :  { %v517_v16 = vpack.c.bf16 %v516_v15, %v516_v15 }
 0xfd3   :  { %v519_v17 = vrot.slane %v517_v16, 1 }
 0xfd5   :  { %520 = vrot.lane.b32.xlu1 %v519_v17, %s886_s2 }
0x1047   :  { %v521_v18 = vpop.permute.xlu1 %520 }
0x1048   :  { %802 = vmatmul.mubr.msk.bf16.vlgmr.msra.gmra.mxu0 %vm130_vm3, %v521_v18 }
0x1108   :  { %v559_v19 = vpop.f32.mrf.mxu0 }
0x1109   :  { %v566_v20 = vrot.slane %v559_v19, 4 }
0x110a   :  { %v803_v21 = vpop.f32.mrf.mxu0 }
0x110b   :  { %v568_v22 = vadd.f32 %v566_v20, %v946_v11 }
0x110c   :  { %v562_v25 = vpop.f32.mrf.mxu0 }
0x110d   :  { %867 = vtanh.f32 %v568_v22  ;;  %v723_v28 = vmul.f32 -1.442695, %v568_v22 }
0x110e   :  { %v804_v26 = vpop.f32.mrf.mxu0 }
0x110f   :  { %869 = vpow2.f32 %v723_v28 }
0x111a   :  { %v868_v27 = vpop.eup %867 }
0x111b   :  { %581 = vrot.lane.b32.xlu0 %v868_v27, %s885_s0 }
0x111c   :  { %v870_v29 = vpop.eup %869 }
0x111d   :  { %v572_v30 = vadd.f32 1.0, %v870_v29 }
0x111f   :  { %871 = vrcp.f32 %v572_v30 }
0x112c   :  { %v872_v31 = vpop.eup %871 }
0x112d   :  { %v579_v34 = vmul.f32 %v872_v31, %v577_v33 }
0x118d   :  { %v582_v32 = vpop.permute.xlu0 %581 }
0x118e   :  { %v584_v8 = vmul.f32 %v872_v31, %v582_v32 }
0x1190   :  { %586 = vrot.lane.b32.xlu1 %v584_v8, %s885_s0 }
0x1202   :  { %v587_v35 = vpop.permute.xlu1 %586 }
0x1203   :  { %v589_v36 = vadd.f32 %v587_v35, %v579_v34 }
0x1205   :  { %873 = vtanh.f32 %v589_v36  ;;  %v656_v56 = vrot.slane %v589_v36, 6 }
0x1212   :  { %v874_v37 = vpop.eup %873 }
0x1213   :  { %592 = vrot.lane.b32.xlu0 %v874_v37, %s885_s0 }
0x1285   :  { %v593_v38 = vpop.permute.xlu0 %592 }
0x1286   :  { %v595_v39 = vmul.f32 %v872_v31, %v593_v38 }
0x1288   :  { %v596_v40 = vpack.c.bf16 %v595_v39, %v595_v39 }
0x128a   :  { %v598_v41 = vrot.slane %v596_v40, 2 }
0x128c   :  { %599 = vrot.lane.b32.xlu1 %v598_v41, %s886_s2 }
0x12fe   :  { %v600_v42 = vpop.permute.xlu1 %599 }
0x12ff   :  { %810 = vmatmul.mubr.msk.bf16.vlgmr.msra.gmra.mxu1 %vm130_vm3, %v600_v42 }
0x13bf   :  { %v638_v43 = vpop.f32.mrf.mxu1 }
0x13c0   :  { %v645_v44 = vrot.slane %v638_v43, 2 }
0x13c1   :  { %v811_v45 = vpop.f32.mrf.mxu1 }
0x13c2   :  { %v647_v46 = vadd.f32 %v645_v44, %v946_v11  ;;  %v726_v11 = vld [vmem:[%s1055_s4] ss:$0 sm:$0xff] }
0x13c3   :  { %v641_v47 = vpop.f32.mrf.mxu1 }
0x13c4   :  { %875 = vtanh.f32 %v647_v46  ;;  %v725_v50 = vmul.f32 -1.442695, %v647_v46 }
0x13c5   :  { %v812_v48 = vpop.f32.mrf.mxu1 }
0x13c6   :  { %877 = vpow2.f32 %v725_v50 }
0x13d1   :  { %v876_v49 = vpop.eup %875 }
0x13d2   :  { %660 = vrot.lane.b32.xlu0 %v876_v49, %s885_s0 }
0x13d3   :  { %v878_v51 = vpop.eup %877 }
0x13d4   :  { %v651_v52 = vadd.f32 1.0, %v878_v51 }
0x13d6   :  { %879 = vrcp.f32 %v651_v52 }
0x13e3   :  { %v880_v53 = vpop.eup %879 }
0x13e4   :  { %v658_v57 = vmul.f32 %v880_v53, %v656_v56 }
0x1444   :  { %v661_v54 = vpop.permute.xlu0 %660 }
0x1445   :  { %v663_v55 = vmul.f32 %v880_v53, %v661_v54 }
0x1447   :  { %665 = vrot.lane.b32.xlu1 %v663_v55, %s885_s0 }
0x144b   :  { %681 = vrot.lane.b32.xlu1 %v726_v11, %s886_s2 }
0x14b9   :  { %v666_v58 = vpop.permute.xlu1 %665 }
0x14ba   :  { %v668_v59 = vadd.f32 %v666_v58, %v658_v57 }
0x14bc   :  { %881 = vtanh.f32 %v668_v59 }
0x14bd   :  { %v682_v63 = vpop.permute.xlu1 %681 }
0x14c9   :  { %v882_v60 = vpop.eup %881 }
0x14ca   :  { %671 = vrot.lane.b32.xlu0 %v882_v60, %s885_s0 }
0x153c   :  { %v672_v62 = vpop.permute.xlu0 %671 }
0x153d   :  { %v674_v1 = vmul.f32 %v880_v53, %v672_v62 }
0x153f   :  { %v684_v2 = vmul.f32 %v682_v63, %v674_v1 }
0x1541   :  { %686 = vrot.lane.b32.xlu0 %v684_v2, %s886_s2 }
0x15b3   :  { %v687_v3 = vpop.permute.xlu0 %686 }
0x15b4   :  { %v690_v4 = vsel %vm689_vm4, %v687_v3, 0.0 }
0x15b5   :  { %691 = vadd.xlane.f32.xlu1 %v690_v4 }
0x163e   :  { %v692_v5 = vpop.xlane.xlu1 %691 }
0x163f   :  { %v700_v6 = vadd.f32 %v727_v23, %v692_v5 }
0x1641   :  { %702 = vst.msk [vmem:[%s1057_s6 - $0x6] sm:$0xc0] %vm701_vm5, %v700_v6 }

</bundles_post_ra>
